<compile_context>
chip_gen: v7x
topology: tpu7x:2x2x1
jax: 0.10.0
libtpu: 0.0.40
codegen_flags: <defaults>
</compile_context>

<pallas_src>
import functools

import jax
import jax.numpy as jnp
from jax.experimental import pallas as pl
from jax.experimental.pallas import tpu as pltpu

_BIG = 1e30


def _round_up(n, m):
    return ((n + m - 1) // m) * m


def _pick_tile(n, candidates=(512, 256, 128)):
    """Largest tile from candidates that divides n (n is padded to 128)."""
    for t in candidates:
        if n >= t and n % t == 0:
            return t
    return n


def _is_v5e():
    # v5e has no bf16 EUP/VPU — keep the softmax exp in f32 there.
    try:
        kind = jax.devices()[0].device_kind.lower()
        return ("v5 lite" in kind) or ("v5e" in kind) or ("v5litepod" in kind)
    except Exception:
        return False


# ---------------------------------------------------------------------------
# Fused projection kernel:
#   feat_aug = x @ W_aug + ones_row   (bf16 out, extra ones column per head)
#   scores   = x @ [W a_l | W a_r]    (f32 out, 2H columns)
# ---------------------------------------------------------------------------

def _linear_fused_kernel(x_ref, w_ref, ws_ref, ones_ref, feat_ref, score_ref):
    xb = x_ref[...]                                   # bf16 (cast in wrapper)
    f = jnp.dot(xb, w_ref[...], preferred_element_type=jnp.float32)
    feat_ref[...] = (f + ones_ref[...]).astype(feat_ref.dtype)
    score_ref[...] = jnp.dot(xb, ws_ref[...], preferred_element_type=jnp.float32)


def linear_fused_pallas(x_bf16, w_aug_bf16, w_scores_bf16, ones_row):
    N, K = x_bf16.shape
    HDa = w_aug_bf16.shape[1]
    S = w_scores_bf16.shape[1]
    tm = _pick_tile(N)
    return pl.pallas_call(
        _linear_fused_kernel,
        out_shape=(jax.ShapeDtypeStruct((N, HDa), jnp.bfloat16),
                   jax.ShapeDtypeStruct((N, S), jnp.float32)),
        grid=(N // tm,),
        in_specs=[
            pl.BlockSpec((tm, K), lambda i: (i, 0)),
            pl.BlockSpec((K, HDa), lambda i: (0, 0)),
            pl.BlockSpec((K, S), lambda i: (0, 0)),
            pl.BlockSpec((1, HDa), lambda i: (0, 0)),
        ],
        out_specs=(
            pl.BlockSpec((tm, HDa), lambda i: (i, 0)),
            pl.BlockSpec((tm, S), lambda i: (i, 0)),
        ),
        compiler_params=pltpu.CompilerParams(dimension_semantics=("parallel",)),
    )(x_bf16, w_aug_bf16, w_scores_bf16, ones_row)


# ---------------------------------------------------------------------------
# Plain projection kernel (residual projection), bf16 MXU operands, f32 out
# ---------------------------------------------------------------------------

def _linear_kernel(x_ref, w_ref, o_ref):
    o_ref[...] = jnp.dot(x_ref[...], w_ref[...], preferred_element_type=jnp.float32)


def linear_pallas(x_bf16, w_bf16):
    N, K = x_bf16.shape
    M = w_bf16.shape[1]
    tm = _pick_tile(N)
    return pl.pallas_call(
        _linear_kernel,
        out_shape=jax.ShapeDtypeStruct((N, M), jnp.float32),
        grid=(N // tm,),
        in_specs=[
            pl.BlockSpec((tm, K), lambda i: (i, 0)),
            pl.BlockSpec((K, M), lambda i: (0, 0)),
        ],
        out_specs=pl.BlockSpec((tm, M), lambda i: (i, 0)),
        compiler_params=pltpu.CompilerParams(dimension_semantics=("parallel",)),
    )(x_bf16, w_bf16)


# ---------------------------------------------------------------------------
# Flash-style GAT attention kernel (all heads per tile, int8 adjacency stream)
# ---------------------------------------------------------------------------

def _gat_attn_kernel(*refs, num_heads, head_dim, aug_dim, negative_slope,
                     apply_elu, mean_heads, has_residual, exp_dtype):
    if has_residual:
        (feat_ref, elt_ref, er_ref, adj_ref, bias_ref, res_ref,
         o_ref, m_sc, acc_sc) = refs
    else:
        (feat_ref, elt_ref, er_ref, adj_ref, bias_ref,
         o_ref, m_sc, acc_sc) = refs
        res_ref = None

    H, D, Da = num_heads, head_dim, aug_dim
    j = pl.program_id(1)

    @pl.when(j == 0)
    def _init():
        m_sc[...] = jnp.full(m_sc.shape, -jnp.inf, dtype=m_sc.dtype)
        acc_sc[...] = jnp.zeros(acc_sc.shape, dtype=acc_sc.dtype)

    # Additive edge mask rebuilt in-kernel from the int8 0/1 adjacency tile:
    # 0.0 on edges, -1e30 on non-edges (cast + sub + mul, no select, per tile).
    adjb = (adj_ref[...].astype(jnp.float32) - 1.0) * _BIG        # (Td, Ts)
    feat = feat_ref[...]                                          # (Ts, H*Da) bf16
    el_all = elt_ref[...]                                         # (H, Ts)  f32
    er_all = er_ref[...]                                          # (Td, H)  f32
    # Read scratch once per grid step; write back with whole-tile stores below.
    m_old_all = m_sc[...]                                         # (Td, H)
    acc_old_all = acc_sc[...]                                     # (Td, H*Da)

    m_news, acc_news = [], []
    for h in range(H):                       # static unroll, H is small
        s = er_all[:, h:h + 1] + el_all[h:h + 1, :]               # (Td, Ts)
        s = jnp.maximum(s, negative_slope * s)                    # leaky_relu
        s = s + adjb
        m_old = m_old_all[:, h:h + 1]
        m_new = jnp.maximum(m_old, jnp.max(s, axis=-1, keepdims=True))
        alpha = jnp.exp(m_old - m_new)                            # (Td, 1) f32
        # bf16 exp on v6e/v7x (single EUP relief); f32 on v5e.
        p = jnp.exp((s - m_new).astype(exp_dtype)).astype(jnp.bfloat16)
        # The ones column in feat makes the last lane of acc carry sum(p).
        acc_h = alpha * acc_old_all[:, h * Da:(h + 1) * Da] + jnp.dot(
            p, feat[:, h * Da:(h + 1) * Da], preferred_element_type=jnp.float32)
        m_news.append(m_new)
        acc_news.append(acc_h)

    m_sc[...] = jnp.concatenate(m_news, axis=-1)      # one dense store
    acc_sc[...] = jnp.concatenate(acc_news, axis=-1)  # one dense store

    @pl.when(j == pl.num_programs(1) - 1)
    def _finalize():
        acc = acc_sc[...]
        outs = []
        for h in range(H):
            num = acc[:, h * Da:h * Da + D]
            den = acc[:, h * Da + D:h * Da + D + 1]   # accumulated sum of attn weights
            outs.append(num * pl.reciprocal(den, approx=True))
        out = jnp.concatenate(outs, axis=-1)          # (Td, H*D)
        if has_residual:
            out = out + res_ref[...]
        out = out + bias_ref[...]
        if apply_elu:
            # ELU: clamp the exp argument so the discarded branch can't overflow.
            out = jnp.where(out > 0, out, jnp.exp(jnp.minimum(out, 0.0)) - 1.0)
        if mean_heads:
            red = out[:, 0:D]
            for h in range(1, H):
                red = red + out[:, h * D:(h + 1) * D]
            out = red * (1.0 / H)
        o_ref[...] = out.astype(o_ref.dtype)


def gat_attention_pallas(feat_aug, el_t, er, adj_i8, bias, res, *,
                         num_heads, head_dim, negative_slope,
                         apply_elu, mean_heads, exp_dtype):
    """feat_aug:(N,H*(D+1)) bf16, el_t:(H,N) f32, er:(N,H) f32, adj_i8:(N,N) int8,
    bias:(1,H*D) f32, res:(N,H*D) f32 or None.
    Returns (N, H*D) f32 (concat heads) or (N, D) f32 (mean heads)."""
    N, _ = feat_aug.shape
    H, D = num_heads, head_dim
    Da = D + 1
    Td = _pick_tile(N, (256, 128))   # modest tiles: compute-heavy per tile, and
    Ts = Td                          # keeps s/p temporaries small on v5e/v7x VMEM
    out_dim = D if mean_heads else H * D
    has_residual = res is not None

    kernel = functools.partial(
        _gat_attn_kernel, num_heads=H, head_dim=D, aug_dim=Da,
        negative_slope=negative_slope, apply_elu=apply_elu,
        mean_heads=mean_heads, has_residual=has_residual, exp_dtype=exp_dtype)

    in_specs = [
        pl.BlockSpec((Ts, H * Da), lambda i, j: (j, 0)),   # feat_aug (src tile)
        pl.BlockSpec((H, Ts), lambda i, j: (0, j)),        # el^T     (src tile)
        pl.BlockSpec((Td, H), lambda i, j: (i, 0)),        # er       (dst tile)
        pl.BlockSpec((Td, Ts), lambda i, j: (i, j)),       # adjacency int8 0/1
        pl.BlockSpec((1, H * D), lambda i, j: (0, 0)),     # bias (shared)
    ]
    inputs = [feat_aug, el_t, er, adj_i8, bias]
    if has_residual:
        in_specs.append(pl.BlockSpec((Td, H * D), lambda i, j: (i, 0)))
        inputs.append(res)

    return pl.pallas_call(
        kernel,
        out_shape=jax.ShapeDtypeStruct((N, out_dim), jnp.float32),
        grid=(N // Td, N // Ts),
        in_specs=in_specs,
        out_specs=pl.BlockSpec((Td, out_dim), lambda i, j: (i, 0)),
        scratch_shapes=[
            pltpu.VMEM((Td, H), jnp.float32),        # running max
            pltpu.VMEM((Td, H * Da), jnp.float32),   # running (weighted feat | sum)
        ],
        compiler_params=pltpu.CompilerParams(
            dimension_semantics=("parallel", "arbitrary"),
            vmem_limit_bytes=32 * 1024 * 1024),
    )(*inputs)


# ---------------------------------------------------------------------------
# GAT forward (glue)
# ---------------------------------------------------------------------------

def gat_layer_forward(h, params, adj_i8, *, negative_slope, use_residual,
                      apply_elu, mean_heads, exp_dtype):
    H, D = params["attn_l"].shape
    Da = D + 1
    K = h.shape[1]
    W = params["W"]                                          # (K, H*D) f32

    # Fold attention vectors into the projection: el = (h@W_h)·a_l = h@(W_h a_l).
    W_heads = W.reshape(K, H, D)
    w_el = jnp.einsum("khd,hd->kh", W_heads, params["attn_l"])   # (K, H)
    w_er = jnp.einsum("khd,hd->kh", W_heads, params["attn_r"])   # (K, H)
    w_scores = jnp.concatenate([w_el, w_er], axis=1).astype(jnp.bfloat16)

    # Augment projection with one zero column per head; the in-kernel +ones_row
    # turns it into a constant 1 so sum(p) falls out of the p@feat matmul.
    W_aug = jnp.concatenate(
        [W_heads, jnp.zeros((K, H, 1), W.dtype)], axis=2).reshape(K, H * Da)
    W_aug = W_aug.astype(jnp.bfloat16)
    ones_row = jnp.tile(
        jnp.concatenate([jnp.zeros((1, D), jnp.float32),
                         jnp.ones((1, 1), jnp.float32)], axis=1), (1, H))

    h_bf = h.astype(jnp.bfloat16)        # cast activations once for both projections
    feat_aug, scores = linear_fused_pallas(h_bf, W_aug, w_scores, ones_row)
    el_t = scores[:, :H].T                                       # (H, N)  tiny
    er = scores[:, H:]                                           # (N, H)  tiny

    res = None
    if use_residual:
        if params["res_W"] is not None:
            res = linear_pallas(h_bf, params["res_W"].astype(jnp.bfloat16))
        else:
            res = h                                              # identity residual

    return gat_attention_pallas(
        feat_aug, el_t, er, adj_i8, params["bias"].reshape(1, H * D), res,
        num_heads=H, head_dim=D, negative_slope=negative_slope,
        apply_elu=apply_elu, mean_heads=mean_heads, exp_dtype=exp_dtype)


def gat_forward(adj, x, params_list, *, negative_slope, residual):
    N = x.shape[0]
    N_pad = _round_up(max(N, 128), 128)      # keep dst/src tiles 128-aligned
    pad = N_pad - N

    # int8 0/1 adjacency (4x less HBM than f32 bias). Padded rows/cols are all
    # zero → fully masked in-kernel → padded nodes never contaminate real ones.
    adj_i8 = (adj > 0).astype(jnp.int8)
    if pad:
        adj_i8 = jnp.pad(adj_i8, ((0, pad), (0, pad)))
        x = jnp.pad(x, ((0, pad), (0, 0)))

    exp_dtype = jnp.float32 if _is_v5e() else jnp.bfloat16

    h = x
    L = len(params_list)
    for l, params in enumerate(params_list):
        is_last = (l == L - 1)
        h = gat_layer_forward(
            h, params, adj_i8,
            negative_slope=negative_slope,
            use_residual=(residual and l > 0),   # first layer never has residual
            apply_elu=(not is_last),             # last layer has activation=None
            mean_heads=is_last,                  # fused .flatten(1) / .mean(1)
            exp_dtype=exp_dtype)
    return h[:N]


# ---------------------------------------------------------------------------
# Deterministic parameter init + example
# ---------------------------------------------------------------------------

def init_gat_params(key, n_layers, in_feats, n_hidden, n_classes, heads):
    params_list = []
    in_dim = in_feats
    for l in range(n_layers):
        out_dim = n_classes if l == n_layers - 1 else n_hidden
        H = heads[l]
        key, k_w, k_al, k_ar, k_res = jax.random.split(key, 5)
        scale = 1.0 / jnp.sqrt(jnp.float32(in_dim))
        p = {
            "W": jax.random.normal(k_w, (in_dim, H * out_dim), jnp.float32) * scale,
            "attn_l": jax.random.normal(k_al, (H, out_dim), jnp.float32) * 0.1,
            "attn_r": jax.random.normal(k_ar, (H, out_dim), jnp.float32) * 0.1,
            "bias": jnp.zeros((H, out_dim), jnp.float32),
            "res_W": None,
        }
        # residual projection only when shapes mismatch (as in DGL GATConv)
        if l > 0 and in_dim != H * out_dim:
            p["res_W"] = (jax.random.normal(k_res, (in_dim, H * out_dim),
                                            jnp.float32) * scale)
        params_list.append(p)
        in_dim = H * out_dim
    return params_list


if __name__ == "__main__":
    # Small synthetic configuration.
    n_layers = 3
    in_feats = 16
    n_hidden = 8
    n_classes = 4
    heads = [2, 2, 2]
    negative_slope = 0.2
    residual = True
    N = 32  # number of graph nodes

    key = jax.random.PRNGKey(0)
    key, k_feat, k_adj = jax.random.split(key, 3)

    # Node features.
    x = jax.random.normal(k_feat, (N, in_feats), jnp.float32)

    # Random sparse graph as a dense 0/1 adjacency, with self-loops so every
    # destination node has at least one incoming edge.
    adj = (jax.random.uniform(k_adj, (N, N)) < 0.2).astype(jnp.float32)
    adj = jnp.maximum(adj, jnp.eye(N, dtype=jnp.float32))

    params_list = init_gat_params(key, n_layers, in_feats, n_hidden, n_classes, heads)

    out = gat_forward(adj, x, params_list,
                      negative_slope=negative_slope, residual=residual)
    out = jax.block_until_ready(out)
    assert out.shape == (N, n_classes), out.shape
    assert bool(jnp.all(jnp.isfinite(out)))
    print("KERNEL_OK")
</pallas_src>

<mosaic_0001>
module attributes {stable_mosaic.version = 11 : i64} {
  func.func @_linear_fused_kernel(%arg0: i32, %arg1: memref<128x16xbf16, #tpu.memory_space<vmem>>, %arg2: memref<16x18xbf16, #tpu.memory_space<vmem>>, %arg3: memref<16x4xbf16, #tpu.memory_space<vmem>>, %arg4: memref<1x18xf32, #tpu.memory_space<vmem>>, %arg5: memref<128x18xbf16, #tpu.memory_space<vmem>>, %arg6: memref<128x4xf32, #tpu.memory_space<vmem>>) attributes {dimension_semantics = [#tpu.dimension_semantics<parallel>], iteration_bounds = array<i64: 1>, scalar_prefetch = 0 : i64, scratch_operands = 0 : i64, tpu.core_type = #tpu.core_type<tc>, window_params = [{transform_indices = @transform_0, window_bounds = array<i64: 128, 16>}, {pipeline_mode = #tpu.pipeline_mode<synchronous>, transform_indices = @transform_1, window_bounds = array<i64: 16, 18>}, {pipeline_mode = #tpu.pipeline_mode<synchronous>, transform_indices = @transform_2, window_bounds = array<i64: 16, 4>}, {pipeline_mode = #tpu.pipeline_mode<synchronous>, transform_indices = @transform_3, window_bounds = array<i64: 1, 18>}, {transform_indices = @transform_4, window_bounds = array<i64: 128, 18>}, {transform_indices = @transform_5, window_bounds = array<i64: 128, 4>}]} {
    %c0 = arith.constant 0 : index
    %c0_0 = arith.constant 0 : index
    %0 = vector.load %arg1[%c0, %c0_0] : memref<128x16xbf16, #tpu.memory_space<vmem>>, vector<128x16xbf16>
    %c0_1 = arith.constant 0 : index
    %c0_2 = arith.constant 0 : index
    %1 = vector.load %arg2[%c0_1, %c0_2] : memref<16x18xbf16, #tpu.memory_space<vmem>>, vector<16x18xbf16>
    %cst = arith.constant dense<0.000000e+00> : vector<128x18xf32>
    %2 = tpu.matmul %0, %1, %cst {dimension_numbers = #tpu.dot_dimension_numbers<[1], [0], [0], [1], [0, 0, 1, 1], [], []>} : vector<128x16xbf16>, vector<16x18xbf16>, vector<128x18xf32> -> vector<128x18xf32>
    %c0_3 = arith.constant 0 : index
    %c0_4 = arith.constant 0 : index
    %3 = vector.load %arg4[%c0_3, %c0_4] : memref<1x18xf32, #tpu.memory_space<vmem>>, vector<1x18xf32>
    %4 = vector.broadcast %3 : vector<1x18xf32> to vector<128x18xf32>
    %5 = arith.addf %2, %4 : vector<128x18xf32>
    %6 = arith.truncf %5 : vector<128x18xf32> to vector<128x18xbf16>
    %c0_5 = arith.constant 0 : index
    %c0_6 = arith.constant 0 : index
    %7 = vector.load %arg5[%c0_5, %c0_6] : memref<128x18xbf16, #tpu.memory_space<vmem>>, vector<128x18xbf16>
    tpu.vector_store %arg5[%c0_5, %c0_6], %6 {strides = array<i32>} : memref<128x18xbf16, #tpu.memory_space<vmem>>, vector<128x18xbf16>,
    %c0_7 = arith.constant 0 : index
    %c0_8 = arith.constant 0 : index
    %8 = vector.load %arg3[%c0_7, %c0_8] : memref<16x4xbf16, #tpu.memory_space<vmem>>, vector<16x4xbf16>
    %cst_9 = arith.constant dense<0.000000e+00> : vector<128x4xf32>
    %9 = tpu.matmul %0, %8, %cst_9 {dimension_numbers = #tpu.dot_dimension_numbers<[1], [0], [0], [1], [0, 0, 1, 1], [], []>} : vector<128x16xbf16>, vector<16x4xbf16>, vector<128x4xf32> -> vector<128x4xf32>
    %c0_10 = arith.constant 0 : index
    %c0_11 = arith.constant 0 : index
    %10 = vector.load %arg6[%c0_10, %c0_11] : memref<128x4xf32, #tpu.memory_space<vmem>>, vector<128x4xf32>
    tpu.vector_store %arg6[%c0_10, %c0_11], %9 {strides = array<i32>} : memref<128x4xf32, #tpu.memory_space<vmem>>, vector<128x4xf32>,
    return
  }
  func.func @transform_0(%arg0: i32) -> (i32, i32) {
    %c0_i32 = arith.constant 0 : i32
    %c0_i32_0 = arith.constant 0 : i32
    return %arg0, %c0_i32 : i32, i32
  }
  func.func @transform_1(%arg0: i32) -> (i32, i32) {
    %c0_i32 = arith.constant 0 : i32
    %c0_i32_0 = arith.constant 0 : i32
    %c0_i32_1 = arith.constant 0 : i32
    return %c0_i32, %c0_i32_0 : i32, i32
  }
  func.func @transform_2(%arg0: i32) -> (i32, i32) {
    %c0_i32 = arith.constant 0 : i32
    %c0_i32_0 = arith.constant 0 : i32
    %c0_i32_1 = arith.constant 0 : i32
    return %c0_i32, %c0_i32_0 : i32, i32
  }
  func.func @transform_3(%arg0: i32) -> (i32, i32) {
    %c0_i32 = arith.constant 0 : i32
    %c0_i32_0 = arith.constant 0 : i32
    %c0_i32_1 = arith.constant 0 : i32
    return %c0_i32, %c0_i32_0 : i32, i32
  }
  func.func @transform_4(%arg0: i32) -> (i32, i32) {
    %c0_i32 = arith.constant 0 : i32
    %c0_i32_0 = arith.constant 0 : i32
    return %arg0, %c0_i32 : i32, i32
  }
  func.func @transform_5(%arg0: i32) -> (i32, i32) {
    %c0_i32 = arith.constant 0 : i32
    %c0_i32_0 = arith.constant 0 : i32
    return %arg0, %c0_i32 : i32, i32
  }
}

</mosaic_0001>

<bundles_post_ra>
// kernel: tpu_custom_call.1
= control target key start
LH: loop header
LB: loop body
LE: loop exit
PB: predicated region body
PF: predicated region fallthrough
CT: control target
= control target key end

     0   :  { %vm91_vm0 = vcmask 130048   ;;  %vm399_vm1 = vcmask 31744   ;;  %vm277_vm2 = vcmask 142336   ;;  %s772_s1 = inlined_call_operand.vmem [shape: bf16[16,18], index: 1, kind: input, shape index: {}]   ;;  %s773_s2 = inlined_call_operand.vmem [shape: bf16[16,4], index: 2, kind: input, shape index: {}]   ;;  %s774_s0 = inlined_call_operand.vmem [shape: bf16[128,16], index: 0, kind: input, shape index: {}]   ;;  %s775_s3 = inlined_call_operand.vmem [shape: f32[1,18], index: 3, kind: input, shape index: {}]   ;;  %s776_s5 = inlined_call_operand.vmem [shape: f32[128,4], index: 5, kind: output, shape index: {1}]   ;;  %s777_s4 = inlined_call_operand.vmem [shape: bf16[128,18], index: 4, kind: output, shape index: {0}]  }
   0x1   :  { %v537_v0 = vld [vmem:[%s772_s1] sm:$0xff]   ;;  %v540_v3 = vld [vmem:[%s774_s0 + $0x8] sm:$0xff]   ;;  %v541_v4 = vld [vmem:[%s774_s0 + $0x10] sm:$0xff]  }
   0x2   :  { %v538_v1 = vld [vmem:[%s773_s2] sm:$0xff]   ;;  %501 = vmatprep.subr.bf16.mxu0 %v537_v0  ;;  %v542_v5 = vld [vmem:[%s774_s0 + $0x18] sm:$0xff]   ;;  %v544_v7 = vld [vmem:[%s774_s0 + $0x28] sm:$0xff]  }
   0x3   :  { %v539_v2 = vld [vmem:[%s774_s0] sm:$0xff]   ;;  %502 = vmatpush3.bf16.msra.mxu0 %v537_v0  ;;  %519 = vmatprep.subr.bf16.mxu1 %v538_v1  ;;  %v545_v8 = vld [vmem:[%s774_s0 + $0x30] sm:$0xff]   ;;  %v546_v9 = vld [vmem:[%s774_s0 + $0x38] sm:$0xff]  }
   0x4   :  { %520 = vmatpush3.bf16.msra.mxu1 %v538_v1  ;;  %503 = vmatprep.mubr.msk.bf16.mxu0 %vm91_vm0, %v539_v2  ;;  %v543_v6 = vld [vmem:[%s774_s0 + $0x20] sm:$0xff]  }
   0x5   :  { %521 = vmatprep.mubr.msk.bf16.mxu1 %vm91_vm0, %v539_v2  ;;  %v626_v10 = vld [vmem:[%s775_s3] ss:$0 sm:$0xff] }
   0x6   :  { %504 = vmatmul.mubr.msk.bf16.vlgmr.msra.gmra.mrb[0].mxu0 %vm91_vm0, %v540_v3 }
   0x7   :  { %522 = vmatmul.mubr.msk.bf16.vlgmr.msra.gmra.mrb[0].mxu1 %vm91_vm0, %v540_v3  ;;  %507 = vmatprep.mubr.msk.bf16.mxu0 %vm91_vm0, %v541_v4 }
   0x8   :  { %525 = vmatprep.mubr.msk.bf16.mxu1 %vm91_vm0, %v541_v4 }
   0xe   :  { %508 = vmatmul.mubr.msk.bf16.gmra.mrb[4].mxu0 %vm91_vm0, %v542_v5 }
   0xf   :  { %526 = vmatmul.mubr.msk.bf16.gmra.mrb[4].mxu1 %vm91_vm0, %v542_v5  ;;  %511 = vmatprep.mubr.msk.bf16.mxu0 %vm91_vm0, %v543_v6 }
  0x10   :  { %529 = vmatprep.mubr.msk.bf16.mxu1 %vm91_vm0, %v543_v6 }
  0x16   :  { %512 = vmatmul.mubr.msk.bf16.gmra.mrb[8].mxu0 %vm91_vm0, %v544_v7 }
  0x17   :  { %530 = vmatmul.mubr.msk.bf16.gmra.mrb[8].mxu1 %vm91_vm0, %v544_v7  ;;  %515 = vmatprep.mubr.msk.bf16.mxu0 %vm91_vm0, %v545_v8 }
  0x18   :  { %533 = vmatprep.mubr.msk.bf16.mxu1 %vm91_vm0, %v545_v8 }
  0x1e   :  { %516 = vmatmul.mubr.msk.bf16.gmra.mrb[12].mxu0 %vm91_vm0, %v546_v9 }
  0x1f   :  { %534 = vmatmul.mubr.msk.bf16.gmra.mrb[12].mxu1 %vm91_vm0, %v546_v9 }
  0xd9   :  { %v505_v11 = vpop.f32.mrb[0].mxu0 }
  0xda   :  { %v159_v12 = vadd.f32 %v505_v11, %v626_v10  ;;  %v150_v13 = vpop.f32.mrb[1].mxu0  ;;  %v523_v14 = vpop.f32.mrb[0].mxu1 }
  0xdb   :  { %v151_v15 = vadd.f32 %v626_v10, %v150_v13  ;;  %402 = vst.msk [vmem:[%s776_s5 + $0x10] sm:$0xff] %vm399_vm1, %v523_v14  ;;  %v506_v16 = vpop.f32.mrb[2].mxu0  ;;  %v336_v17 = vpop.f32.mrb[1].mxu1 }
  0xdc   :  { %v469_v18 = vpack.c.bf16 %v159_v12, %v159_v12  ;;  %v162_v19 = vadd.f32 %v506_v16, %v626_v10  ;;  %400 = vst.msk [vmem:[%s776_s5] sm:$0xff] %vm399_vm1, %v336_v17  ;;  %v153_v20 = vpop.f32.mrb[3].mxu0  ;;  %v524_v21 = vpop.f32.mrb[2].mxu1 }
  0xdd   :  { %v467_v22 = vpack.c.bf16 %v151_v15, %v151_v15  ;;  %v154_v23 = vadd.f32 %v626_v10, %v153_v20  ;;  %403 = vst.msk [vmem:[%s776_s5 + $0x18] sm:$0xff] %vm399_vm1, %v524_v21  ;;  %v339_v24 = vpop.f32.mrb[3].mxu1 }
  0xde   :  { %280 = vst.msk [vmem:[%s777_s4 + $0x8] sm:$0xf] %vm277_vm2, %v469_v18  ;;  %v470_v25 = vpack.c.bf16 %v162_v19, %v162_v19 }
  0xdf   :  { %401 = vst.msk [vmem:[%s776_s5 + $0x8] sm:$0xff] %vm399_vm1, %v339_v24  ;;  %v468_v26 = vpack.c.bf16 %v154_v23, %v154_v23 }
  0xe0   :  { %278 = vst.msk [vmem:[%s777_s4] sm:$0xf] %vm277_vm2, %v467_v22  ;;  %281 = vst.msk [vmem:[%s777_s4 + $0xc] sm:$0xf] %vm277_vm2, %v470_v25 }
  0xe1   :  { %279 = vst.msk [vmem:[%s777_s4 + $0x4] sm:$0xf] %vm277_vm2, %v468_v26  ;;  %v509_v27 = vpop.f32.mrb[4].mxu0 }
  0xe2   :  { %v175_v28 = vadd.f32 %v509_v27, %v626_v10  ;;  %v166_v29 = vpop.f32.mrb[5].mxu0  ;;  %v527_v30 = vpop.f32.mrb[4].mxu1 }
  0xe3   :  { %v167_v31 = vadd.f32 %v626_v10, %v166_v29  ;;  %406 = vst.msk [vmem:[%s776_s5 + $0x30] sm:$0xff] %vm399_vm1, %v527_v30  ;;  %v510_v32 = vpop.f32.mrb[6].mxu0  ;;  %v352_v33 = vpop.f32.mrb[5].mxu1 }
  0xe4   :  { %v473_v34 = vpack.c.bf16 %v175_v28, %v175_v28  ;;  %v178_v35 = vadd.f32 %v510_v32, %v626_v10  ;;  %404 = vst.msk [vmem:[%s776_s5 + $0x20] sm:$0xff] %vm399_vm1, %v352_v33  ;;  %v169_v36 = vpop.f32.mrb[7].mxu0  ;;  %v528_v37 = vpop.f32.mrb[6].mxu1 }
  0xe5   :  { %v471_v38 = vpack.c.bf16 %v167_v31, %v167_v31  ;;  %v170_v39 = vadd.f32 %v626_v10, %v169_v36  ;;  %407 = vst.msk [vmem:[%s776_s5 + $0x38] sm:$0xff] %vm399_vm1, %v528_v37  ;;  %v355_v40 = vpop.f32.mrb[7].mxu1 }
  0xe6   :  { %284 = vst.msk [vmem:[%s777_s4 + $0x18] sm:$0xf] %vm277_vm2, %v473_v34  ;;  %v474_v41 = vpack.c.bf16 %v178_v35, %v178_v35 }
  0xe7   :  { %405 = vst.msk [vmem:[%s776_s5 + $0x28] sm:$0xff] %vm399_vm1, %v355_v40  ;;  %v472_v42 = vpack.c.bf16 %v170_v39, %v170_v39 }
  0xe8   :  { %282 = vst.msk [vmem:[%s777_s4 + $0x10] sm:$0xf] %vm277_vm2, %v471_v38  ;;  %285 = vst.msk [vmem:[%s777_s4 + $0x1c] sm:$0xf] %vm277_vm2, %v474_v41 }
  0xe9   :  { %283 = vst.msk [vmem:[%s777_s4 + $0x14] sm:$0xf] %vm277_vm2, %v472_v42  ;;  %v513_v43 = vpop.f32.mrb[8].mxu0 }
  0xea   :  { %v191_v44 = vadd.f32 %v513_v43, %v626_v10  ;;  %v182_v45 = vpop.f32.mrb[9].mxu0  ;;  %v531_v46 = vpop.f32.mrb[8].mxu1 }
  0xeb   :  { %v183_v47 = vadd.f32 %v626_v10, %v182_v45  ;;  %410 = vst.msk [vmem:[%s776_s5 + $0x50] sm:$0xff] %vm399_vm1, %v531_v46  ;;  %v514_v48 = vpop.f32.mrb[10].mxu0  ;;  %v368_v49 = vpop.f32.mrb[9].mxu1 }
  0xec   :  { %v477_v50 = vpack.c.bf16 %v191_v44, %v191_v44  ;;  %v194_v51 = vadd.f32 %v514_v48, %v626_v10  ;;  %408 = vst.msk [vmem:[%s776_s5 + $0x40] sm:$0xff] %vm399_vm1, %v368_v49  ;;  %v185_v52 = vpop.f32.mrb[11].mxu0  ;;  %v532_v53 = vpop.f32.mrb[10].mxu1 }
  0xed   :  { %v475_v54 = vpack.c.bf16 %v183_v47, %v183_v47  ;;  %v186_v55 = vadd.f32 %v626_v10, %v185_v52  ;;  %411 = vst.msk [vmem:[%s776_s5 + $0x58] sm:$0xff] %vm399_vm1, %v532_v53  ;;  %v371_v56 = vpop.f32.mrb[11].mxu1 }
  0xee   :  { %288 = vst.msk [vmem:[%s777_s4 + $0x28] sm:$0xf] %vm277_vm2, %v477_v50  ;;  %v478_v57 = vpack.c.bf16 %v194_v51, %v194_v51 }
  0xef   :  { %409 = vst.msk [vmem:[%s776_s5 + $0x48] sm:$0xff] %vm399_vm1, %v371_v56  ;;  %v476_v58 = vpack.c.bf16 %v186_v55, %v186_v55 }
  0xf0   :  { %286 = vst.msk [vmem:[%s777_s4 + $0x20] sm:$0xf] %vm277_vm2, %v475_v54  ;;  %289 = vst.msk [vmem:[%s777_s4 + $0x2c] sm:$0xf] %vm277_vm2, %v478_v57 }
  0xf1   :  { %287 = vst.msk [vmem:[%s777_s4 + $0x24] sm:$0xf] %vm277_vm2, %v476_v58  ;;  %v517_v59 = vpop.f32.mrb[12].mxu0 }
  0xf2   :  { %v207_v60 = vadd.f32 %v517_v59, %v626_v10  ;;  %v198_v61 = vpop.f32.mrb[13].mxu0  ;;  %v535_v62 = vpop.f32.mrb[12].mxu1 }
  0xf3   :  { %v199_v63 = vadd.f32 %v626_v10, %v198_v61  ;;  %414 = vst.msk [vmem:[%s776_s5 + $0x70] sm:$0xff] %vm399_vm1, %v535_v62  ;;  %v518_v0 = vpop.f32.mrb[14].mxu0  ;;  %v384_v1 = vpop.f32.mrb[13].mxu1 }
  0xf4   :  { %v481_v2 = vpack.c.bf16 %v207_v60, %v207_v60  ;;  %v210_v3 = vadd.f32 %v518_v0, %v626_v10  ;;  %412 = vst.msk [vmem:[%s776_s5 + $0x60] sm:$0xff] %vm399_vm1, %v384_v1  ;;  %v201_v4 = vpop.f32.mrb[15].mxu0  ;;  %v536_v5 = vpop.f32.mrb[14].mxu1 }
  0xf5   :  { %v479_v6 = vpack.c.bf16 %v199_v63, %v199_v63  ;;  %v202_v7 = vadd.f32 %v626_v10, %v201_v4  ;;  %415 = vst.msk [vmem:[%s776_s5 + $0x78] sm:$0xff] %vm399_vm1, %v536_v5  ;;  %v387_v8 = vpop.f32.mrb[15].mxu1 }
  0xf6   :  { %292 = vst.msk [vmem:[%s777_s4 + $0x38] sm:$0xf] %vm277_vm2, %v481_v2  ;;  %v482_v9 = vpack.c.bf16 %v210_v3, %v210_v3 }
  0xf7   :  { %413 = vst.msk [vmem:[%s776_s5 + $0x68] sm:$0xff] %vm399_vm1, %v387_v8  ;;  %v480_v10 = vpack.c.bf16 %v202_v7, %v202_v7 }
  0xf8   :  { %290 = vst.msk [vmem:[%s777_s4 + $0x30] sm:$0xf] %vm277_vm2, %v479_v6  ;;  %293 = vst.msk [vmem:[%s777_s4 + $0x3c] sm:$0xf] %vm277_vm2, %v482_v9 }
  0xf9   :  { %291 = vst.msk [vmem:[%s777_s4 + $0x34] sm:$0xf] %vm277_vm2, %v480_v10 }

</bundles_post_ra>
